<compile_context>
chip_gen: v7x
topology: tpu7x:2x2x1
jax: 0.10.0
libtpu: 0.0.40
codegen_flags: <defaults>
</compile_context>

<pallas_src>
import functools

import jax
import jax.numpy as jnp
import numpy as np
from jax.experimental import pallas as pl
from jax.experimental.pallas import tpu as pltpu


# ----------------------------------------------------------------------------
# Pallas kernel: per-lane sums of sigmoid(x)^2 over one objectness channel.
# x block (kernel view): (bpb, S*S)  ->  partial output block: (1, S*S)
# ----------------------------------------------------------------------------
def _obj_sq_kernel(x_ref, part_ref, *, batch, block_b, need_mask):
    x = x_ref[...].astype(jnp.float32)                 # (bpb, ss), f32 compute
    # sigmoid via a single EUP tanh push: sigmoid(x) = 0.5 * (1 + tanh(x/2)).
    s = 0.5 * (1.0 + jnp.tanh(0.5 * x))
    sq = s * s
    if need_mask:
        # Last batch block may extend past B: zero the padded (garbage) rows.
        g = pl.program_id(0)
        rows = jax.lax.broadcasted_iota(jnp.int32, sq.shape, 0) + g * block_b
        sq = jnp.where(rows < batch, sq, 0.0)
    # Sublane (batch) reduction on the XLU; output stays lane-dense (1, ss).
    part_ref[...] = jnp.sum(sq, axis=0, keepdims=True)


def objectness_sq_sum(x, five_plus_c, yolo_step=3, vmem_block_budget=8 << 20):
    """Sum of sigmoid(x)^2 over all objectness channels (c % (5+C) == 0)."""
    B, c_total, S1, S2 = x.shape
    ss = S1 * S2
    fc = five_plus_c

    # Free row-major reshape.  The channel axis stays OUTSIDE the trailing
    # (1, ss) dims, so a size-1 channel block equals the full array dim and
    # the (8,128) BlockSpec constraint is satisfied for any S.
    # TODO(synk): for real YOLO grids where S*S is not a multiple of 128
    # (169/676/2704) the (1, ss) loads/stores become masked; padding ss to a
    # multiple of 128 would make them lane-dense at the cost of a copy.
    x4 = x.reshape(B, c_total, 1, ss)

    itemsize = jnp.dtype(x.dtype).itemsize
    # Only one channel per batch per grid step is resident; keep the
    # double-buffered input block inside the budget (safe for v5e's 16 MiB
    # scoped default and v7x's 64 MiB physical VMEM -- no vmem_limit needed).
    bpb = int(max(1, min(B, vmem_block_budget // (2 * ss * itemsize))))
    grid_b = pl.cdiv(B, bpb)
    need_mask = (B % bpb) != 0

    kernel = functools.partial(_obj_sq_kernel, batch=B, block_b=bpb,
                               need_mask=need_mask)

    part = pl.pallas_call(
        kernel,
        out_shape=jax.ShapeDtypeStruct((grid_b, yolo_step, 1, ss), jnp.float32),
        grid=(grid_b, yolo_step),
        # Only the 3 objectness channels (k * (5+C)) are ever DMA'd from HBM.
        in_specs=[pl.BlockSpec((bpb, None, None, ss),
                               lambda g, k: (g, k * fc, 0, 0))],
        out_specs=pl.BlockSpec((None, None, 1, ss),
                               lambda g, k: (g, k, 0, 0)),
        compiler_params=pltpu.CompilerParams(
            dimension_semantics=("parallel", "parallel")),
    )(x4)

    # Tiny epilogue reduce in the wrapper (no in-kernel cross-step accumulator).
    return jnp.sum(part)


# ----------------------------------------------------------------------------
# Yolo module (forward / loss) built around the Pallas kernel.
# ----------------------------------------------------------------------------
ANCHOR = np.array(
    [[10, 13], [16, 30], [33, 23], [30, 61], [62, 45],
     [59, 119], [116, 90], [156, 198], [373, 326]], dtype=np.float32)


class YoloPallas:
    def __init__(self, s_index, e_index, S, C, img_size, lambda_coord,
                 lambda_noobj):
        self.S = S
        self.C = C
        self.s_index = s_index
        self.e_index = e_index
        self.img_size = float(img_size)
        self.yolo_step = 3
        self.N = self.yolo_step * (5 + C)
        self.lambda_coord = float(lambda_coord)
        self.lambda_noobj = float(lambda_noobj)
        self.anchor = jnp.asarray(ANCHOR)

    def __call__(self, x, n_box, n_index):
        C = self.C
        fc = 5 + C

        # Hot path: lambda_noobj sum over objectness channels (Pallas kernel).
        obj_sq_sum = objectness_sq_sum(x, fc, self.yolo_step)

        loss = jnp.zeros((), jnp.float32)
        excl = jnp.zeros((), jnp.float32)

        if n_box.shape[0] != 0:
            nb = n_box.astype(jnp.float32)
            ni = n_index.astype(jnp.int32)

            # PyTorch filters boxes with boolean indexing (dynamic shape);
            # here each box contributes through a 0/1 validity weight.
            valid = ((ni >= self.s_index) & (ni <= self.e_index)).astype(
                jnp.float32)

            now_index = jnp.clip(ni - self.s_index, 0, self.yolo_step - 1)
            div = self.img_size / self.S

            b_idx = nb[:, 0].astype(jnp.int32)
            cls = nb[:, 1].astype(jnp.int32)
            ix = (nb[:, 2] / div).astype(jnp.int32)
            iy = (nb[:, 3] / div).astype(jnp.int32)
            alpha_x = (nb[:, 2] - ix.astype(jnp.float32) * div) / div
            alpha_y = (nb[:, 3] - iy.astype(jnp.float32) * div) / div

            # Gather the raw logits of the cell owning each box (tiny gather),
            # then sigmoid the (box, N) slab; identical to gathering sigmoid(x).
            cell_raw = x[b_idx[:, None],
                         jnp.arange(self.N)[None, :],
                         ix[:, None],
                         iy[:, None]]
            cell = jax.nn.sigmoid(cell_raw.astype(jnp.float32))

            base = now_index * fc
            conf = jnp.take_along_axis(cell, base[:, None], axis=1)[:, 0]
            r_ax = jnp.take_along_axis(cell, (base + 1)[:, None], axis=1)[:, 0]
            r_ay = jnp.take_along_axis(cell, (base + 2)[:, None], axis=1)[:, 0]
            r_tw = jnp.take_along_axis(cell, (base + 3)[:, None], axis=1)[:, 0]
            r_th = jnp.take_along_axis(cell, (base + 4)[:, None], axis=1)[:, 0]
            label = jnp.take_along_axis(
                cell, base[:, None] + 5 + jnp.arange(C)[None, :], axis=1)

            res_w = self.anchor[ni, 0] * jnp.exp(4.0 * r_tw - 2.0)
            res_h = self.anchor[ni, 1] * jnp.exp(4.0 * r_th - 2.0)
            hot_enco = jax.nn.one_hot(cls, C, dtype=jnp.float32)

            loss = loss + self.lambda_coord * jnp.sum(valid * (conf - 1.0) ** 2)
            loss = loss + jnp.sum(valid[:, None] * (label - hot_enco) ** 2)
            loss = loss + jnp.sum(valid * (r_ax - alpha_x) ** 2)
            loss = loss + jnp.sum(valid * (r_ay - alpha_y) ** 2)
            loss = loss + jnp.sum(
                valid * (res_w / self.img_size - nb[:, 4] / self.img_size) ** 2)
            loss = loss + jnp.sum(
                valid * (res_h / self.img_size - nb[:, 5] / self.img_size) ** 2)

            # check[...] = False at ground-truth cells: subtract those cells'
            # contribution from the full objectness sum computed in the kernel.
            # TODO(synk): assumes distinct (batch, anchor, cell) per valid box;
            # duplicate GT cells would be excluded twice here (PyTorch excludes
            # them once via the boolean mask).
            excl = jnp.sum(valid * conf ** 2)

        loss = loss + self.lambda_noobj * (obj_sq_sum - excl)
        return loss.reshape(1)


# ----------------------------------------------------------------------------
# Pure-numpy reference (mirrors the PyTorch code, incl. boolean check mask).
# ----------------------------------------------------------------------------
def reference_loss(x, n_box, n_index, yolo):
    x = np.asarray(x, dtype=np.float64)
    sig = 1.0 / (1.0 + np.exp(-x))
    C = yolo.C
    fc = 5 + C
    check = np.zeros(x.shape, dtype=bool)
    check[:, 0] = True
    check[:, fc] = True
    check[:, 2 * fc] = True
    loss = 0.0

    nb = np.asarray(n_box, dtype=np.float64)
    ni = np.asarray(n_index)
    if nb.shape[0] != 0:
        val = (ni >= yolo.s_index) & (ni <= yolo.e_index)
        box = nb[val]
        if box.shape[0] != 0:
            idx = ni[val]
            now = idx - yolo.s_index
            div = yolo.img_size / yolo.S
            bi = box[:, 0].astype(int)
            ixx = (box[:, 2] / div).astype(int)
            iyy = (box[:, 3] / div).astype(int)
            ax = (box[:, 2] - ixx * div) / div
            ay = (box[:, 3] - iyy * div) / div
            check[bi, now * fc, ixx, iyy] = False
            cell = sig[bi, :, ixx, iyy]                     # (box, N)
            r = np.arange(len(bi))
            base = now * fc
            conf = cell[r, base]
            rax = cell[r, base + 1]
            ray = cell[r, base + 2]
            rw = ANCHOR[idx, 0] * np.exp(4 * cell[r, base + 3] - 2)
            rh = ANCHOR[idx, 1] * np.exp(4 * cell[r, base + 4] - 2)
            label = cell[r[:, None], base[:, None] + 5 + np.arange(C)[None, :]]
            hot = np.zeros((len(bi), C))
            hot[r, box[:, 1].astype(int)] = 1.0
            loss += yolo.lambda_coord * np.sum((conf - 1.0) ** 2)
            loss += np.sum((label - hot) ** 2)
            loss += np.sum((rax - ax) ** 2) + np.sum((ray - ay) ** 2)
            loss += np.sum((rw / yolo.img_size - box[:, 4] / yolo.img_size) ** 2)
            loss += np.sum((rh / yolo.img_size - box[:, 5] / yolo.img_size) ** 2)

    loss += yolo.lambda_noobj * np.sum(sig[check] ** 2)
    return loss


# ----------------------------------------------------------------------------
if __name__ == "__main__":
    # Small synthetic configuration consistent with the module.
    S, C = 16, 4
    img_size = 256.0
    s_index, e_index = 0, 2           # this scale owns anchors 0..2
    lambda_coord, lambda_noobj = 5.0, 0.5
    B = 2
    Nch = 3 * (5 + C)                 # 27 channels

    key = jax.random.PRNGKey(0)
    x = jax.random.normal(key, (B, Nch, S, S), dtype=jnp.float32)

    # n_box columns: [batch_index, class, cx, cy, w, h]
    n_box = jnp.array(
        [[0.0, 1.0, 40.0, 72.0, 50.0, 80.0],
         [1.0, 3.0, 130.5, 200.0, 60.0, 40.0],
         [0.0, 0.0, 200.0, 16.0, 120.0, 90.0],
         [1.0, 2.0, 100.0, 100.0, 30.0, 30.0]], dtype=jnp.float32)
    n_index = jnp.array([0, 2, 1, 5], dtype=jnp.int32)   # last box: other scale

    yolo = YoloPallas(s_index, e_index, S, C, img_size, lambda_coord,
                      lambda_noobj)

    loss = jax.block_until_ready(yolo(x, n_box, n_index))

    ref = reference_loss(np.asarray(x), np.asarray(n_box), np.asarray(n_index),
                         yolo)
    np.testing.assert_allclose(float(loss[0]), ref, rtol=2e-4, atol=1e-4)

    print("KERNEL_OK")
</pallas_src>

<mosaic_0001>
module attributes {stable_mosaic.version = 11 : i64} {
  func.func @_obj_sq_kernel(%arg0: i32, %arg1: i32, %arg2: memref<2x1x1x256xf32, #tpu.memory_space<vmem>>, %arg3: memref<1x1x1x256xf32, #tpu.memory_space<vmem>>) attributes {dimension_semantics = [#tpu.dimension_semantics<parallel>, #tpu.dimension_semantics<parallel>], iteration_bounds = array<i64: 1, 3>, scalar_prefetch = 0 : i64, scratch_operands = 0 : i64, tpu.core_type = #tpu.core_type<tc>, window_params = [{transform_indices = @transform_0, window_bounds = array<i64: 2, 1, 1, 256>}, {transform_indices = @transform_1, window_bounds = array<i64: 1, 1, 1, 256>}]} {
    %c0 = arith.constant 0 : index
    %c0_0 = arith.constant 0 : index
    %c0_1 = arith.constant 0 : index
    %c0_2 = arith.constant 0 : index
    %0 = vector.load %arg2[%c0, %c0_0, %c0_1, %c0_2] : memref<2x1x1x256xf32, #tpu.memory_space<vmem>>, vector<2x1x1x256xf32>
    %1 = vector.shape_cast %0 : vector<2x1x1x256xf32> to vector<2x256xf32>
    %cst = arith.constant 5.000000e-01 : f32
    %2 = vector.broadcast %cst : f32 to vector<2x256xf32>
    %3 = arith.mulf %2, %1 : vector<2x256xf32>
    %4 = math.tanh %3 : vector<2x256xf32>
    %cst_3 = arith.constant 1.000000e+00 : f32
    %5 = vector.broadcast %cst_3 : f32 to vector<2x256xf32>
    %6 = arith.addf %5, %4 : vector<2x256xf32>
    %cst_4 = arith.constant 5.000000e-01 : f32
    %7 = vector.broadcast %cst_4 : f32 to vector<2x256xf32>
    %8 = arith.mulf %7, %6 : vector<2x256xf32>
    %9 = arith.mulf %8, %8 : vector<2x256xf32>
    %cst_5 = arith.constant dense<0.000000e+00> : vector<256xf32>
    %10 = vector.multi_reduction <add>, %9, %cst_5 [0] : vector<2x256xf32> to vector<256xf32>
    %11 = vector.shape_cast %10 : vector<256xf32> to vector<1x256xf32>
    %c0_6 = arith.constant 0 : index
    %c0_7 = arith.constant 0 : index
    %c0_8 = arith.constant 0 : index
    %c0_9 = arith.constant 0 : index
    %12 = vector.load %arg3[%c0_6, %c0_7, %c0_8, %c0_9] : memref<1x1x1x256xf32, #tpu.memory_space<vmem>>, vector<1x1x1x256xf32>
    %13 = vector.shape_cast %12 : vector<1x1x1x256xf32> to vector<1x256xf32>
    %14 = vector.shape_cast %11 : vector<1x256xf32> to vector<1x1x1x256xf32>
    tpu.vector_store %arg3[%c0_6, %c0_7, %c0_8, %c0_9], %14 {strides = array<i32>} : memref<1x1x1x256xf32, #tpu.memory_space<vmem>>, vector<1x1x1x256xf32>,
    return
  }
  func.func @transform_0(%arg0: i32, %arg1: i32) -> (i32, i32, i32, i32) {
    %c9_i32 = arith.constant 9 : i32
    %0 = arith.muli %arg1, %c9_i32 : i32
    %c0_i32 = arith.constant 0 : i32
    %c0_i32_0 = arith.constant 0 : i32
    %c0_i32_1 = arith.constant 0 : i32
    return %arg0, %0, %c0_i32, %c0_i32_0 : i32, i32, i32, i32
  }
  func.func @transform_1(%arg0: i32, %arg1: i32) -> (i32, i32, i32, i32) {
    %c0_i32 = arith.constant 0 : i32
    %c0_i32_0 = arith.constant 0 : i32
    %c0_i32_1 = arith.constant 0 : i32
    return %arg0, %arg1, %c0_i32, %c0_i32_0 : i32, i32, i32, i32
  }
}

</mosaic_0001>

<bundles_post_ra>
// kernel: tpu_custom_call.1
= control target key start
LH: loop header
LB: loop body
LE: loop exit
PB: predicated region body
PF: predicated region fallthrough
CT: control target
= control target key end

     0   :  { %6 = vsyncpa [#allocation3], 0  ;;  %s802_s0 = inlined_call_operand.hbm [shape: f32[2,27,1,256], index: 0, kind: input, shape index: {}]   ;;  %s803_s1 = inlined_call_operand.hbm [shape: f32[1,3,1,256], index: 1, kind: output, shape index: {}]  }
   0x1   :  { %8 = vsyncpa [#allocation3 + $0x1], 0 }
   0x2   :  { %9 = vsyncpa [#allocation4], 0 }
   0x3   :  { %11 = vsyncpa [#allocation4 + $0x1], 0  ;;  %s604_s6 = smov 0   ;;  %s606_s7 = smov 0  }
   0x4   :  { %s608_s8 = smov 0   ;;  %s610_s9 = smov 0  }
   0x5   :  { %s612_s10 = smov 0   ;;  %s614_s11 = smov 0  }
   0x6   :  { %s616_s12 = smov 0   ;;  %s618_s13 = smov 0  }
   0x7   :  { %s620_s14 = smov 0  }
   0x8 LB: > { %s337_s15 = sadd.s32 4294967295, %s586_s14   ;;  %s338_s16 = sadd.s32 4294967294, %s586_s14   ;;  %s586_s14 = sphi %s620_s14, %s17_s14   ;;  %s582_s13 = sphi %s618_s13, %s820_s13   ;;  %s578_s12 = sphi %s616_s12, %s819_s12   ;;  %s574_s11 = sphi %s614_s11, %s818_s11   ;;  %s570_s10 = sphi %s612_s10, %s817_s10   ;;  %s566_s9 = sphi %s610_s9, %s816_s9   ;;  %s562_s8 = sphi %s608_s8, %s815_s8   ;;  %s558_s7 = sphi %s606_s7, %s814_s7   ;;  %s554_s6 = sphi %s604_s6, %s813_s6  }
   0x9   : > { %s26_s17 = sadd.s32 1, %s582_s13  ;;  %s33_s18 = smul.u32 9, %s582_s13 }
   0xa   : > { %p27_p0 = scmp.ge.s32.totalorder %s26_s17, 3  ;;  %s40_s19 = sadd.s32 1, %s574_s11 }
   0xb   : > { %p47_p1 = scmp.ne.s32.totalorder %s574_s11, %s570_s10  ;;  %p48_p2 = scmp.eq.s32.totalorder %s586_s14, 0 }
   0xc   : > { %s822_s17 = smov (%p27_p0, %s26_s17), 0  ;;  %p53_p4 = scmp.ne.s32.totalorder %s570_s10, %s566_s9 }
   0xd   : > { %p657_p3 = por %p48_p2, %p47_p1  ;;  %s34_s21 = smul.u32 9, %s822_s17 }
   0xe   : > { %p54_p5 = scmp.eq.s32.totalorder %s337_s15, 0  ;;  %s64_s22 = ssub.s32 %s582_s13, %s822_s17 }
   0xf   : > { %s68_s23 = sadd.s32 1, %s562_s8  ;;  %s36_s24 = ssub.s32 %s33_s18, %s34_s21 }
  0x10   : > { %p666_p6 = por %p54_p5, %p53_p4  ;;  %p38_p7 = scmp.eq.s32.totalorder %s36_s24, 0 }
  0x11   : > { %p66_p8 = scmp.eq.s32.totalorder %s64_s22, 0  ;;  %p78_p9 = scmp.ne.s32.totalorder %s562_s8, %s558_s7 }
  0x12   : > { %p79_p10 = scmp.eq.s32.totalorder %s337_s15, 2  ;;  %p84_p12 = scmp.ne.s32.totalorder %s558_s7, %s554_s6 }
  0x13   : > { %s673_s26 = scalar_select %p38_p7, %s574_s11, %s40_s19  }
  0x14   : > { %s676_s27 = scalar_select %p66_p8, %s562_s8, %s68_s23  }
  0x15   : > { %p678_p11 = por %p79_p10, %p78_p9  ;;  %p85_p13 = scmp.eq.s32.totalorder %s338_s16, 2 }
  0x16   : > { %p368_p0 = scmp.lt.s32.totalorder %s586_s14, 3  ;;  %s105_s29 = sand.u32 1, %s574_s11  }
  0x17   : > { %s807_s28 = scalar_select %p678_p11, 1, 0 }
  0x18   : > { %p686_p1 = por %p85_p13, %p84_p12  ;;  %s341_s2 = sshll.u32 %s105_s29, 2 }
  0x19   : > { %s355_s3 = smul.u32 288, %s582_s13  ;;  %p693_p2 = pnand %p368_p0, %p657_p3 }
  0x1a   : > { %s808_s30 = scalar_select %p686_p1, 1, 0 }
  0x1b   : > { %s700_s15 = scalar_lea.hbm %s802_s0, %s355_s3  ;;  %s109_s16 = scalar_lea.vmem [#allocation2], %s341_s2 }
  0x1c   : > { %s120_s18 = sshll.u32 %s109_s16, 4  ;;  %s705_s19 = scalar_lea.sflag [#allocation3], %s105_s29  ;;  %s702_s18 = int_to_ptr.vmem [resolvable:$true] %s120_s18 }
  0x1d   : > { %s450_s20 = scalar_lea.hbm %s700_s15, 64  ;;  %p452_p5 = pneg %p693_p2 }
  0x1e   : > { %p451_p3 = scmp.ne.s32.totalorder %s700_s15, %s450_s20  ;;  %s455_s23 = scalar_lea.hbm %s802_s0, 1728 }
  0x1f   : > { %p456_p9 = scmp.lt.u32.totalorder %s700_s15, %s802_s0  ;;  %p457_p10 = scmp.lt.u32.totalorder %s455_s23, %s450_s20 }
  0x20   : > { %p453_p7 = pnand %p452_p5, %p451_p3  ;;  %p459_p13 = scmp.lt.u32.totalorder %s450_s20, %s700_s15 }
  0x21   : > { %p458_p12 = por %p457_p10, %p456_p9 }
  0x22   : > { %p454_p8 = pneg %p453_p7 }
  0x23   : > { %p460_p0 = por %p459_p13, %p458_p12 }
  0x25   : > { %p461_p4 = pnand %p460_p0, %p454_p8 }
  0x27   : > { %464 = shalt.err (!%p461_p4)
}
  0x28   : > { %s465_s29 = scalar_lea.vmem %s702_s18, 64  ;;  %s588_s3 = smov [#allocation2]  }
  0x29   : > { %p466_p3 = scmp.ne.s32.totalorder %s702_s18, %s465_s29  ;;  %s470_s5 = sshll.u32 %s588_s3, 4  ;;  %s471_s5 = int_to_ptr.vmem [resolvable:$false] %s470_s5 }
  0x2a   : > { %s472_s9 = scalar_lea.vmem %s471_s5, 128  ;;  %p473_p11 = scmp.lt.s32.totalorder %s702_s18, %s471_s5 }
  0x2b   : > { %p468_p7 = pnand %p466_p3, %p452_p5  ;;  %p474_p9 = scmp.lt.s32.totalorder %s472_s9, %s465_s29 }
  0x2d   : > { %p469_p1 = pneg %p468_p7  ;;  %p475_p10 = por %p474_p9, %p473_p11 }
  0x2f   : > { %p476_p12 = pnand %p475_p10, %p469_p1 }
  0x31   : > { %479 = shalt.err (!%p476_p12)
}
  0x32   : > { %s589_s16 = smov 864   ;;  %s590_s20 = smov 32  }
  0x33   : > { %s591_s21 = smov 2   ;;  %p128_p4 = scmp.lt.s32.totalorder %s586_s14, 4 }
  0x34   : > { %363 = dma.hbm_to_vmem [thread:$0]  (!%p693_p2), %s700_s15, 64, %s702_s18, %s705_s19, %s589_s16, %s590_s20, %s591_s21  }
  0x35   : > { %p810_p5 = scmp.ge.s32.totalorder %s586_s14, 1 }
  0x37   : > { %p129_p8 = pnand %p810_p5, %p128_p4 }
  0x38   : > { %s134_s22 = sand.u32 (!%p129_p8), 1, %s570_s10  }
  0x39   : > { %132 = sbr.rel (%p129_p8) target bundleno = 127 (0x7f), region = 24  ;;  %s345_s23 = sshll.u32 (!%p129_p8), %s134_s22, 2 }
  0x3a   : > { %s135_s24 = scalar_lea.sflag (!%p129_p8), [#allocation3], %s134_s22  ;;  %s138_s2 = scalar_lea.vmem (!%p129_p8), [#allocation2], %s345_s23 }
  0x40   : > { %545 = dma.done.wait (%p666_p6), %s135_s24, 64  }
  0x41   : > { %547 = vsyncadd (%p666_p6), %s135_s24, 4294967232  ;;  %v159_v0 = vld [vmem:[%s138_s2] sm:$0x3]  ;;  %v160_v1 = vld [vmem:[%s138_s2 + $0x2] sm:$0x3]  ;;  %v177_v6 = vlaneseq  ;;  %vm198_vm0 = vcmask 1041408  }
  0x42   : > { %v161_v2 = vmul.f32 0.5, %v159_v0  ;;  %v162_v3 = vmul.f32 0.5, %v160_v1  ;;  %v592_v4 = vmov 1966171168   ;;  %s154_s25 = sand.u32 1, %s558_s7   ;;  %s354_s19 = sshll.u32 %s578_s12, 5 }
  0x43   : > { %v175_v5 = vunpack.c.l.s4 %v592_v4  ;;  %v178_v12 = vshrl.u32 %v177_v6, 7  ;;  %s346_s4 = sshll.u32 %s154_s25, 1  ;;  %vm233_vm1 = vcmp.lt.s32.totalorder %v177_v6, 256  ;;  %s748_s5 = scalar_lea.hbm %s803_s1, %s354_s19 }
  0x44   : > { %446 = vtanh.f32 %v161_v2  ;;  %s156_s15 = scalar_lea.vmem [#allocation5], %s346_s4  ;;  %s237_s9 = scalar_lea.sflag [#allocation4], %s154_s25 }
  0x45   : > { %448 = vtanh.f32 %v162_v3  ;;  %v176_v11 = vunpack.c.0.s8 %v175_v5  ;;  %s253_s18 = sshll.u32 %s156_s15, 4  ;;  %p811_p11 = scmp.ne.s32.totalorder %s807_s28, 0  ;;  %s743_s18 = int_to_ptr.vmem [resolvable:$true] %s253_s18 }
  0x46   : > { %s480_s16 = scalar_lea.vmem %s743_s18, 32  ;;  %s593_s12 = smov [#allocation5]  }
  0x47   : > { %v179_v17 = vsub.s32 %v176_v11, %v178_v12  ;;  %p481_p6 = scmp.ne.s32.totalorder %s743_s18, %s480_s16  ;;  %s484_s20 = sshll.u32 %s593_s12, 4  ;;  %s485_s20 = int_to_ptr.vmem [resolvable:$false] %s484_s20 }
  0x48   : > { %s486_s21 = scalar_lea.vmem %s485_s20, 64  ;;  %p487_p13 = scmp.lt.s32.totalorder %s743_s18, %s485_s20 }
  0x49   : > { %p482_p1 = pnand %p481_p6, %p811_p11  ;;  %p488_p0 = scmp.lt.s32.totalorder %s486_s21, %s480_s16 }
  0x4b   : > { %p483_p2 = pneg %p482_p1  ;;  %p489_p3 = por %p488_p0, %p487_p13 }
  0x4d   : > { %p490_p7 = pnand %p489_p3, %p483_p2 }
  0x4e   : > { %v447_v7 = vpop.eup %446 }
  0x4f   : > { %v449_v8 = vpop.eup %448  ;;  %v165_v9 = vadd.f32 1.0, %v447_v7 }
  0x50   : > { %v166_v10 = vadd.f32 1.0, %v449_v8 }
  0x51   : > { %v167_v13 = vmul.f32 0.5, %v165_v9 }
  0x52   : > { %v168_v14 = vmul.f32 0.5, %v166_v10 }
  0x53   : > { %v169_v15 = vmul.f32 %v167_v13, %v167_v13 }
  0x54   : > { %v170_v16 = vmul.f32 %v168_v14, %v168_v14 }
  0x56   : > { %v173_v18 = vcombine.low %v169_v15, %v170_v16 }
  0x58   : > { %v180_v19 = vrot.slane %v173_v18, %v179_v17 }
  0x5a   : > { %v181_v20 = vcombine.high %v180_v19, %v180_v19  ;;  %v188_v21 = vrot.slane %v180_v19, %v179_v17 }
  0x5c   : > { %v195_v22 = vrot.slane %v181_v20, %v179_v17  ;;  %v199_v23 = vsel %vm198_vm0, %v188_v21, 0.0 }
  0x5d   : > { %v200_v24 = vrot.slane %v199_v23, 4 }
  0x5e   : > { %v206_v25 = vsel %vm198_vm0, %v195_v22, 0.0 }
  0x5f   : > { %v201_v26 = vadd.f32 %v200_v24, %v199_v23  ;;  %v207_v27 = vrot.slane %v206_v25, 4 }
  0x61   : > { %v202_v28 = vrot.slane %v201_v26, 2  ;;  %v208_v29 = vadd.f32 %v207_v27, %v206_v25 }
  0x63   : > { %v203_v30 = vadd.f32 %v202_v28, %v201_v26  ;;  %v209_v31 = vrot.slane %v208_v29, 2 }
  0x65   : > { %v204_v32 = vrot.slane %v203_v30, 1  ;;  %v210_v33 = vadd.f32 %v209_v31, %v208_v29 }
  0x67   : > { %v205_v34 = vadd.f32 %v204_v32, %v203_v30  ;;  %v211_v35 = vrot.slane %v210_v33, 1 }
  0x69   : > { %v212_v36 = vadd.f32 %v211_v35, %v210_v33 }
  0x6b   : > { %v215_v37 = vcombine.low %v205_v34, %v212_v36 }
  0x6d   : > { %v222_v38 = vrot.slane %v215_v37, %v179_v17 }
  0x6f   : > { %v229_v39 = vrot.slane %v222_v38, %v179_v17 }
  0x71   : > { %235 = vst.msk [vmem:[%s156_s15] sm:$0x3] %vm233_vm1, %v229_v39 }
  0x72   : > { %493 = shalt.err (!%p490_p7)
}
  0x73   : > { %s494_s22 = scalar_lea.hbm %s748_s5, 32  ;;  %s498_s2 = scalar_lea.hbm %s803_s1, 96 }
  0x74   : > { %p495_p9 = scmp.ne.s32.totalorder %s748_s5, %s494_s22  ;;  %p499_p4 = scmp.lt.u32.totalorder %s748_s5, %s803_s1 }
  0x75   : > { %p500_p5 = scmp.lt.u32.totalorder %s498_s2, %s494_s22  ;;  %p502_p6 = scmp.lt.u32.totalorder %s494_s22, %s748_s5 }
  0x76   : > { %p496_p10 = pnand %p495_p9, %p811_p11 }
  0x77   : > { %p501_p8 = por %p500_p5, %p499_p4 }
  0x78   : > { %p497_p12 = pneg %p496_p10 }
  0x79   : > { %p503_p1 = por %p502_p6, %p501_p8 }
  0x7b   : > { %p504_p2 = pnand %p503_p1, %p497_p12 }
  0x7d   : > { %507 = shalt.err (!%p504_p2)
}
  0x7e   : > { %358 = dma.vmem_to_hbm [thread:$0]  (%p811_p11), %s743_s18, 32, %s748_s5, %s237_s9  }
  0x7f PF: > { %p369_p13 = scmp.ge.s32.totalorder %s586_s14, 2  ;;  %s265_s15 = sand.u32 1, %s554_s6  }
  0x80   : > { %p812_p0 = scmp.ne.s32.totalorder %s808_s30, 0  ;;  %s266_s19 = scalar_lea.sflag [#allocation4], %s265_s15 }
  0x82   : > { %p365_p3 = pnand %p369_p13, %p812_p0 }
  0x84   : > { %549 = dma.done.wait (!%p365_p3), %s266_s19, 32  }
  0x85   : > { %551 = vsyncadd (!%p365_p3), %s266_s19, 4294967264  ;;  %s17_s14 = sadd.s32 1, %s586_s14   ;;  %s813_s6 = smov %s558_s7 }
  0x86   : > { %p14_p7 = scmp.ge.s32.totalorder %s17_s14, 5   ;;  %s814_s7 = smov %s562_s8 }
  0x87   : > { %s815_s8 = smov %s676_s27  ;;  %s816_s9 = smov %s570_s10 }
  0x88   : > { %s817_s10 = smov %s574_s11  ;;  %s818_s11 = smov %s673_s26 }
  0x89   : > { %s819_s12 = smov %s582_s13  ;;  %s820_s13 = smov %s822_s17 }
  0x8a   :  { %16 = sbr.rel (!%p14_p7) target bundleno = 8 (0x8), region = 69 }
  0x91   :  { %271 = vsyncpa [#allocation3], 1 }
  0x92   :  { %273 = vsyncpa [#allocation3 + $0x1], 1 }
  0x93   :  { %274 = vsyncpa [#allocation4], 1 }
  0x94   :  { %276 = vsyncpa [#allocation4 + $0x1], 1 }

</bundles_post_ra>
